<compile_context>
chip_gen: v5e
topology: v5e:2x2
jax: 0.10.0
libtpu: 0.0.40
codegen_flags: <defaults>
</compile_context>

<pallas_src>
import functools

import jax
import jax.numpy as jnp
from jax.experimental import pallas as pl
from jax.experimental.pallas import tpu as pltpu

EPS = 1e-5


def _double_conv_kernel(
    x_ref,     # (N*H, W*CIN)         lane-folded input
    wk1_ref,   # (3, W*CIN,  W*COUT)  conv1 block-Toeplitz weights (kw + W-pad folded in)
    wk2_ref,   # (3, W*COUT, W*COUT)  conv2 block-Toeplitz weights
    b1_ref, g1_ref, be1_ref,   # (1, W*COUT)  lane-tiled conv1 bias / BN1 gamma / BN1 beta
    b2_ref, g2_ref, be2_ref,   # (1, W*COUT)  lane-tiled conv2 bias / BN2 gamma / BN2 beta
    gmat_ref,  # (W*COUT, W*COUT)  channel mask matrix: [i, j] = (chan(i) == chan(j))
    o_ref,     # (N*H, W*COUT)
    *, N, H, W, COUT):

  NH = N * H
  inv_cnt = 1.0 / float(N * H * W)

  # Loaded once, reused by both BN stages.
  gmat = gmat_ref[...]

  def conv3x3(a, wk_ref, bias_l):
    # a: (NH, width).  Row r corresponds to (n = r // H, h = r % H).
    # One MXU dot per kernel row kh; kw taps, Cin contraction and the W zero
    # padding are contracted inside the MXU via the Toeplitz matrices.
    rows, width = a.shape
    h_id = jax.lax.broadcasted_iota(jnp.int32, (rows, width), 0) % H
    zero_row = jnp.zeros((1, width), jnp.float32)
    # kh = 0 tap: output row h reads input row h-1 -> shift input down, zero h == 0
    # (also zeroes the wrap/cross-batch rows).  kh = 2 tap: symmetric, shift up.
    a_dn = jnp.where(h_id > 0,
                     jnp.concatenate([zero_row, a[:rows - 1, :]], axis=0), 0.0)
    a_up = jnp.where(h_id < (H - 1),
                     jnp.concatenate([a[1:, :], zero_row], axis=0), 0.0)
    y = jnp.dot(a, wk_ref[1], preferred_element_type=jnp.float32)
    y = y + jnp.dot(a_dn, wk_ref[0], preferred_element_type=jnp.float32)
    y = y + jnp.dot(a_up, wk_ref[2], preferred_element_type=jnp.float32)
    return y + bias_l

  def relu_bn(y, gamma_l, beta_l):
    y = jnp.maximum(y, 0.0)
    # One-pass batch statistics (training-mode BN, biased variance).
    s_l = jnp.sum(y, axis=0, keepdims=True)           # (1, M) per-lane sums
    ss_l = jnp.sum(y * y, axis=0, keepdims=True)      # (1, M) per-lane sum of squares
    # Reduce over the W lane-groups and broadcast back to all lanes: a single
    # (2, M) x (M, M) dot for both statistics -> stats stay lane-shaped.
    stats = jnp.dot(jnp.concatenate([s_l, ss_l], axis=0), gmat,
                    preferred_element_type=jnp.float32) * inv_cnt
    m_l = stats[0:1, :]
    var_l = stats[1:2, :] - m_l * m_l
    scale_l = gamma_l * jax.lax.rsqrt(var_l + EPS)    # fused scale/shift
    shift_l = beta_l - m_l * scale_l
    return y * scale_l + shift_l

  y1 = relu_bn(conv3x3(x_ref[...], wk1_ref, b1_ref[...]), g1_ref[...], be1_ref[...])
  y2 = relu_bn(conv3x3(y1, wk2_ref, b2_ref[...]), g2_ref[...], be2_ref[...])
  o_ref[...] = y2


# ----------------------------- wrapper-side prep -----------------------------
def _fold_conv_weight(w_hwio, W):
  """(3,3,ci,co) HWIO -> (3, W*ci, W*co) block-Toeplitz matrices (one per kh).

  Entry [(w_in)*ci + i, (w_out)*co + o] of matrix kh equals w[kh, kw, i, o] for
  w_in = w_out + kw - 1 when that input column exists; the missing diagonals
  implement the zero padding along W.
  """
  _, _, ci, co = w_hwio.shape
  mats = []
  for kh in range(3):
    m = jnp.zeros((W * ci, W * co), jnp.float32)
    for kw in range(3):
      shift = jnp.eye(W, W, k=1 - kw, dtype=jnp.float32)
      m = m + jnp.kron(shift, w_hwio[kh, kw].astype(jnp.float32))
    mats.append(m)
  return jnp.stack(mats)


def _tile_lanes(v, W):
  """(C,) per-channel vector -> (1, W*C) lane-tiled row (lane w*C + c = v[c])."""
  return jnp.tile(v.astype(jnp.float32), (W,)).reshape(1, -1)


def double_conv_pack(x_nchw, params):
  """x_nchw: (N, Cin, H, W) float32. Returns (N, Cout, H, W) float32."""
  w1, b1, g1, be1, w2, b2, g2, be2 = params
  N, CIN, H, W = x_nchw.shape
  COUT = w1.shape[-1]

  # NCHW -> lane-folded (N*H, W*CIN); no jnp.pad pass (padding handled in-kernel).
  x2d = jnp.transpose(x_nchw, (0, 2, 3, 1)).reshape(N * H, W * CIN).astype(jnp.float32)

  wk1 = _fold_conv_weight(w1, W)                       # (3, W*CIN,  W*COUT)
  wk2 = _fold_conv_weight(w2, W)                       # (3, W*COUT, W*COUT)
  gmat = jnp.tile(jnp.eye(COUT, dtype=jnp.float32), (W, W))   # (W*COUT, W*COUT)

  vmem = pl.BlockSpec(memory_space=pltpu.MemorySpace.VMEM)
  kernel = functools.partial(_double_conv_kernel, N=N, H=H, W=W, COUT=COUT)

  out2d = pl.pallas_call(
      kernel,
      out_shape=jax.ShapeDtypeStruct((N * H, W * COUT), jnp.float32),
      in_specs=[vmem] * 10,
      out_specs=vmem,
      compiler_params=pltpu.CompilerParams(vmem_limit_bytes=32 * 1024 * 1024),
  )(
      x2d, wk1, wk2,
      _tile_lanes(b1, W), _tile_lanes(g1, W), _tile_lanes(be1, W),
      _tile_lanes(b2, W), _tile_lanes(g2, W), _tile_lanes(be2, W),
      gmat,
  )
  # Lane-dense (N*H, W*COUT) -> NCHW
  return out2d.reshape(N, H, W, COUT).transpose(0, 3, 1, 2)


# ------------------------ pure-JAX reference (for checking) ------------------
def _ref_block(x_nhwc, w, b, g, be):
  y = jax.lax.conv_general_dilated(
      x_nhwc, w, window_strides=(1, 1), padding="SAME",
      dimension_numbers=("NHWC", "HWIO", "NHWC")) + b
  y = jnp.maximum(y, 0.0)
  m = jnp.mean(y, axis=(0, 1, 2))
  v = jnp.mean((y - m) ** 2, axis=(0, 1, 2))
  return (y - m) * jax.lax.rsqrt(v + EPS) * g + be


def double_conv_pack_ref(x_nchw, params):
  w1, b1, g1, be1, w2, b2, g2, be2 = params
  x = jnp.transpose(x_nchw, (0, 2, 3, 1))
  x = _ref_block(x, w1, b1, g1, be1)
  x = _ref_block(x, w2, b2, g2, be2)
  return jnp.transpose(x, (0, 3, 1, 2))


if __name__ == "__main__":
  N, CIN, COUT, H, W = 2, 4, 8, 16, 16

  key = jax.random.PRNGKey(0)
  ks = jax.random.split(key, 9)
  x = jax.random.normal(ks[0], (N, CIN, H, W), jnp.float32)

  # Deterministic synthetic parameters (shapes per the module's __init__).
  # Conv weights stored HWIO (3,3,in,out); BN gamma/beta per channel.
  w1 = 0.1 * jax.random.normal(ks[1], (3, 3, CIN, COUT), jnp.float32)
  b1 = 0.1 * jax.random.normal(ks[2], (COUT,), jnp.float32)
  g1 = 1.0 + 0.1 * jax.random.normal(ks[3], (COUT,), jnp.float32)
  be1 = 0.1 * jax.random.normal(ks[4], (COUT,), jnp.float32)
  w2 = 0.1 * jax.random.normal(ks[5], (3, 3, COUT, COUT), jnp.float32)
  b2 = 0.1 * jax.random.normal(ks[6], (COUT,), jnp.float32)
  g2 = 1.0 + 0.1 * jax.random.normal(ks[7], (COUT,), jnp.float32)
  be2 = 0.1 * jax.random.normal(ks[8], (COUT,), jnp.float32)

  params = (w1, b1, g1, be1, w2, b2, g2, be2)

  out = jax.block_until_ready(double_conv_pack(x, params))
  ref = jax.block_until_ready(double_conv_pack_ref(x, params))

  assert out.shape == (N, COUT, H, W)
  assert jnp.allclose(out, ref, atol=2e-4, rtol=2e-4)
  print("KERNEL_OK")
</pallas_src>

<mosaic_0001>
module attributes {stable_mosaic.version = 11 : i64} {
  func.func @_double_conv_kernel(%arg0: memref<32x64xf32, #tpu.memory_space<vmem>>, %arg1: memref<3x64x128xf32, #tpu.memory_space<vmem>>, %arg2: memref<3x128x128xf32, #tpu.memory_space<vmem>>, %arg3: memref<1x128xf32, #tpu.memory_space<vmem>>, %arg4: memref<1x128xf32, #tpu.memory_space<vmem>>, %arg5: memref<1x128xf32, #tpu.memory_space<vmem>>, %arg6: memref<1x128xf32, #tpu.memory_space<vmem>>, %arg7: memref<1x128xf32, #tpu.memory_space<vmem>>, %arg8: memref<1x128xf32, #tpu.memory_space<vmem>>, %arg9: memref<128x128xf32, #tpu.memory_space<vmem>>, %arg10: memref<32x128xf32, #tpu.memory_space<vmem>>) attributes {dimension_semantics = [], scalar_prefetch = 0 : i64, scratch_operands = 0 : i64, tpu.core_type = #tpu.core_type<tc>} {
    %c0 = arith.constant 0 : index
    %c0_0 = arith.constant 0 : index
    %0 = vector.load %arg9[%c0, %c0_0] : memref<128x128xf32, #tpu.memory_space<vmem>>, vector<128x128xf32>
    %c0_1 = arith.constant 0 : index
    %c0_2 = arith.constant 0 : index
    %1 = vector.load %arg0[%c0_1, %c0_2] : memref<32x64xf32, #tpu.memory_space<vmem>>, vector<32x64xf32>
    %c0_3 = arith.constant 0 : index
    %c0_4 = arith.constant 0 : index
    %2 = vector.load %arg3[%c0_3, %c0_4] : memref<1x128xf32, #tpu.memory_space<vmem>>, vector<1x128xf32>
    %3 = tpu.iota {dimensions = array<i32: 0>} : vector<32x64xi32>
    %c16_i32 = arith.constant 16 : i32
    %c0_i32 = arith.constant 0 : i32
    %4 = arith.cmpi eq, %c16_i32, %c0_i32 : i32
    %c1_i32 = arith.constant 1 : i32
    %5 = arith.select %4, %c1_i32, %c16_i32 : i32
    %6 = vector.broadcast %5 : i32 to vector<32x64xi32>
    %7 = arith.remsi %3, %6 : vector<32x64xi32>
    %c0_i32_5 = arith.constant 0 : i32
    %8 = vector.broadcast %c0_i32_5 : i32 to vector<32x64xi32>
    %9 = arith.cmpi ne, %7, %8 : vector<32x64xi32>
    %c0_i32_6 = arith.constant 0 : i32
    %10 = vector.broadcast %c0_i32_6 : i32 to vector<32x64xi32>
    %11 = arith.cmpi slt, %7, %10 : vector<32x64xi32>
    %c0_i32_7 = arith.constant 0 : i32
    %12 = arith.cmpi slt, %5, %c0_i32_7 : i32
    %13 = vector.broadcast %12 : i1 to vector<32x64xi1>
    %14 = vector.broadcast %13 : vector<32x64xi1> to vector<32x64xi1>
    %15 = arith.xori %11, %14 : vector<32x64xi1>
    %16 = arith.andi %15, %9 : vector<32x64xi1>
    %17 = vector.broadcast %5 : i32 to vector<32x64xi32>
    %18 = arith.addi %7, %17 : vector<32x64xi32>
    %19 = arith.select %16, %18, %7 : vector<32x64xi1>, vector<32x64xi32>
    %cst = arith.constant 0.000000e+00 : f32
    %20 = vector.broadcast %cst : f32 to vector<1x64xf32>
    %c0_i32_8 = arith.constant 0 : i32
    %21 = vector.broadcast %c0_i32_8 : i32 to vector<32x64xi32>
    %22 = arith.cmpi sgt, %19, %21 : vector<32x64xi32>
    %23 = vector.extract_strided_slice %1 {offsets = [0, 0], sizes = [31, 64], strides = [1, 1]} : vector<32x64xf32> to vector<31x64xf32>
    %24 = tpu.concatenate %20, %23 in 0 : vector<1x64xf32>, vector<31x64xf32> -> vector<32x64xf32>
    %cst_9 = arith.constant 0.000000e+00 : f32
    %25 = vector.broadcast %cst_9 : f32 to vector<32x64xf32>
    %26 = arith.select %22, %24, %25 : vector<32x64xi1>, vector<32x64xf32>
    %c15_i32 = arith.constant 15 : i32
    %27 = vector.broadcast %c15_i32 : i32 to vector<32x64xi32>
    %28 = arith.cmpi slt, %19, %27 : vector<32x64xi32>
    %29 = vector.extract_strided_slice %1 {offsets = [1, 0], sizes = [31, 64], strides = [1, 1]} : vector<32x64xf32> to vector<31x64xf32>
    %30 = tpu.concatenate %29, %20 in 0 : vector<31x64xf32>, vector<1x64xf32> -> vector<32x64xf32>
    %cst_10 = arith.constant 0.000000e+00 : f32
    %31 = vector.broadcast %cst_10 : f32 to vector<32x64xf32>
    %32 = arith.select %28, %30, %31 : vector<32x64xi1>, vector<32x64xf32>
    %c1 = arith.constant 1 : index
    %c0_11 = arith.constant 0 : index
    %c0_12 = arith.constant 0 : index
    %33 = vector.load %arg1[%c1, %c0_11, %c0_12] : memref<3x64x128xf32, #tpu.memory_space<vmem>>, vector<1x64x128xf32>
    %34 = vector.shape_cast %33 : vector<1x64x128xf32> to vector<64x128xf32>
    %cst_13 = arith.constant dense<0.000000e+00> : vector<32x128xf32>
    %35 = tpu.matmul %1, %34, %cst_13 {dimension_numbers = #tpu.dot_dimension_numbers<[1], [0], [0], [1], [0, 0, 1, 1], [], []>} : vector<32x64xf32>, vector<64x128xf32>, vector<32x128xf32> -> vector<32x128xf32>
    %c0_14 = arith.constant 0 : index
    %c0_15 = arith.constant 0 : index
    %c0_16 = arith.constant 0 : index
    %36 = vector.load %arg1[%c0_14, %c0_15, %c0_16] : memref<3x64x128xf32, #tpu.memory_space<vmem>>, vector<1x64x128xf32>
    %37 = vector.shape_cast %36 : vector<1x64x128xf32> to vector<64x128xf32>
    %cst_17 = arith.constant dense<0.000000e+00> : vector<32x128xf32>
    %38 = tpu.matmul %26, %37, %cst_17 {dimension_numbers = #tpu.dot_dimension_numbers<[1], [0], [0], [1], [0, 0, 1, 1], [], []>} : vector<32x64xf32>, vector<64x128xf32>, vector<32x128xf32> -> vector<32x128xf32>
    %39 = arith.addf %35, %38 : vector<32x128xf32>
    %c2 = arith.constant 2 : index
    %c0_18 = arith.constant 0 : index
    %c0_19 = arith.constant 0 : index
    %40 = vector.load %arg1[%c2, %c0_18, %c0_19] : memref<3x64x128xf32, #tpu.memory_space<vmem>>, vector<1x64x128xf32>
    %41 = vector.shape_cast %40 : vector<1x64x128xf32> to vector<64x128xf32>
    %cst_20 = arith.constant dense<0.000000e+00> : vector<32x128xf32>
    %42 = tpu.matmul %32, %41, %cst_20 {dimension_numbers = #tpu.dot_dimension_numbers<[1], [0], [0], [1], [0, 0, 1, 1], [], []>} : vector<32x64xf32>, vector<64x128xf32>, vector<32x128xf32> -> vector<32x128xf32>
    %43 = arith.addf %39, %42 : vector<32x128xf32>
    %44 = vector.broadcast %2 : vector<1x128xf32> to vector<32x128xf32>
    %45 = arith.addf %43, %44 : vector<32x128xf32>
    %c0_21 = arith.constant 0 : index
    %c0_22 = arith.constant 0 : index
    %46 = vector.load %arg4[%c0_21, %c0_22] : memref<1x128xf32, #tpu.memory_space<vmem>>, vector<1x128xf32>
    %c0_23 = arith.constant 0 : index
    %c0_24 = arith.constant 0 : index
    %47 = vector.load %arg5[%c0_23, %c0_24] : memref<1x128xf32, #tpu.memory_space<vmem>>, vector<1x128xf32>
    %cst_25 = arith.constant 0.000000e+00 : f32
    %48 = vector.broadcast %cst_25 : f32 to vector<32x128xf32>
    %49 = arith.maximumf %45, %48 : vector<32x128xf32>
    %cst_26 = arith.constant dense<0.000000e+00> : vector<128xf32>
    %50 = vector.multi_reduction <add>, %49, %cst_26 [0] : vector<32x128xf32> to vector<128xf32>
    %51 = vector.shape_cast %50 : vector<128xf32> to vector<1x128xf32>
    %52 = arith.mulf %49, %49 : vector<32x128xf32>
    %cst_27 = arith.constant dense<0.000000e+00> : vector<128xf32>
    %53 = vector.multi_reduction <add>, %52, %cst_27 [0] : vector<32x128xf32> to vector<128xf32>
    %54 = vector.shape_cast %53 : vector<128xf32> to vector<1x128xf32>
    %55 = tpu.concatenate %51, %54 in 0 : vector<1x128xf32>, vector<1x128xf32> -> vector<2x128xf32>
    %cst_28 = arith.constant dense<0.000000e+00> : vector<2x128xf32>
    %56 = tpu.matmul %55, %0, %cst_28 {dimension_numbers = #tpu.dot_dimension_numbers<[1], [0], [0], [1], [0, 0, 1, 1], [], []>} : vector<2x128xf32>, vector<128x128xf32>, vector<2x128xf32> -> vector<2x128xf32>
    %cst_29 = arith.constant 0.001953125 : f32
    %57 = vector.broadcast %cst_29 : f32 to vector<2x128xf32>
    %58 = arith.mulf %56, %57 : vector<2x128xf32>
    %59 = vector.extract_strided_slice %58 {offsets = [0, 0], sizes = [1, 128], strides = [1, 1]} : vector<2x128xf32> to vector<1x128xf32>
    %60 = vector.extract_strided_slice %58 {offsets = [1, 0], sizes = [1, 128], strides = [1, 1]} : vector<2x128xf32> to vector<1x128xf32>
    %61 = arith.mulf %59, %59 : vector<1x128xf32>
    %62 = arith.subf %60, %61 : vector<1x128xf32>
    %cst_30 = arith.constant 9.99999974E-6 : f32
    %63 = vector.broadcast %cst_30 : f32 to vector<1x128xf32>
    %64 = arith.addf %62, %63 : vector<1x128xf32>
    %65 = math.rsqrt %64 : vector<1x128xf32>
    %66 = arith.mulf %46, %65 : vector<1x128xf32>
    %67 = arith.mulf %59, %66 : vector<1x128xf32>
    %68 = arith.subf %47, %67 : vector<1x128xf32>
    %69 = vector.broadcast %66 : vector<1x128xf32> to vector<32x128xf32>
    %70 = arith.mulf %49, %69 : vector<32x128xf32>
    %71 = vector.broadcast %68 : vector<1x128xf32> to vector<32x128xf32>
    %72 = arith.addf %70, %71 : vector<32x128xf32>
    %c0_31 = arith.constant 0 : index
    %c0_32 = arith.constant 0 : index
    %73 = vector.load %arg6[%c0_31, %c0_32] : memref<1x128xf32, #tpu.memory_space<vmem>>, vector<1x128xf32>
    %74 = tpu.iota {dimensions = array<i32: 0>} : vector<32x128xi32>
    %c16_i32_33 = arith.constant 16 : i32
    %c0_i32_34 = arith.constant 0 : i32
    %75 = arith.cmpi eq, %c16_i32_33, %c0_i32_34 : i32
    %c1_i32_35 = arith.constant 1 : i32
    %76 = arith.select %75, %c1_i32_35, %c16_i32_33 : i32
    %77 = vector.broadcast %76 : i32 to vector<32x128xi32>
    %78 = arith.remsi %74, %77 : vector<32x128xi32>
    %c0_i32_36 = arith.constant 0 : i32
    %79 = vector.broadcast %c0_i32_36 : i32 to vector<32x128xi32>
    %80 = arith.cmpi ne, %78, %79 : vector<32x128xi32>
    %c0_i32_37 = arith.constant 0 : i32
    %81 = vector.broadcast %c0_i32_37 : i32 to vector<32x128xi32>
    %82 = arith.cmpi slt, %78, %81 : vector<32x128xi32>
    %c0_i32_38 = arith.constant 0 : i32
    %83 = arith.cmpi slt, %76, %c0_i32_38 : i32
    %84 = vector.broadcast %83 : i1 to vector<32x128xi1>
    %85 = vector.broadcast %84 : vector<32x128xi1> to vector<32x128xi1>
    %86 = arith.xori %82, %85 : vector<32x128xi1>
    %87 = arith.andi %86, %80 : vector<32x128xi1>
    %88 = vector.broadcast %76 : i32 to vector<32x128xi32>
    %89 = arith.addi %78, %88 : vector<32x128xi32>
    %90 = arith.select %87, %89, %78 : vector<32x128xi1>, vector<32x128xi32>
    %cst_39 = arith.constant 0.000000e+00 : f32
    %91 = vector.broadcast %cst_39 : f32 to vector<1x128xf32>
    %c0_i32_40 = arith.constant 0 : i32
    %92 = vector.broadcast %c0_i32_40 : i32 to vector<32x128xi32>
    %93 = arith.cmpi sgt, %90, %92 : vector<32x128xi32>
    %94 = vector.extract_strided_slice %72 {offsets = [0, 0], sizes = [31, 128], strides = [1, 1]} : vector<32x128xf32> to vector<31x128xf32>
    %95 = tpu.concatenate %91, %94 in 0 : vector<1x128xf32>, vector<31x128xf32> -> vector<32x128xf32>
    %cst_41 = arith.constant 0.000000e+00 : f32
    %96 = vector.broadcast %cst_41 : f32 to vector<32x128xf32>
    %97 = arith.select %93, %95, %96 : vector<32x128xi1>, vector<32x128xf32>
    %c15_i32_42 = arith.constant 15 : i32
    %98 = vector.broadcast %c15_i32_42 : i32 to vector<32x128xi32>
    %99 = arith.cmpi slt, %90, %98 : vector<32x128xi32>
    %100 = vector.extract_strided_slice %72 {offsets = [1, 0], sizes = [31, 128], strides = [1, 1]} : vector<32x128xf32> to vector<31x128xf32>
    %101 = tpu.concatenate %100, %91 in 0 : vector<31x128xf32>, vector<1x128xf32> -> vector<32x128xf32>
    %cst_43 = arith.constant 0.000000e+00 : f32
    %102 = vector.broadcast %cst_43 : f32 to vector<32x128xf32>
    %103 = arith.select %99, %101, %102 : vector<32x128xi1>, vector<32x128xf32>
    %c1_44 = arith.constant 1 : index
    %c0_45 = arith.constant 0 : index
    %c0_46 = arith.constant 0 : index
    %104 = vector.load %arg2[%c1_44, %c0_45, %c0_46] : memref<3x128x128xf32, #tpu.memory_space<vmem>>, vector<1x128x128xf32>
    %105 = vector.shape_cast %104 : vector<1x128x128xf32> to vector<128x128xf32>
    %cst_47 = arith.constant dense<0.000000e+00> : vector<32x128xf32>
    %106 = tpu.matmul %72, %105, %cst_47 {dimension_numbers = #tpu.dot_dimension_numbers<[1], [0], [0], [1], [0, 0, 1, 1], [], []>} : vector<32x128xf32>, vector<128x128xf32>, vector<32x128xf32> -> vector<32x128xf32>
    %c0_48 = arith.constant 0 : index
    %c0_49 = arith.constant 0 : index
    %c0_50 = arith.constant 0 : index
    %107 = vector.load %arg2[%c0_48, %c0_49, %c0_50] : memref<3x128x128xf32, #tpu.memory_space<vmem>>, vector<1x128x128xf32>
    %108 = vector.shape_cast %107 : vector<1x128x128xf32> to vector<128x128xf32>
    %cst_51 = arith.constant dense<0.000000e+00> : vector<32x128xf32>
    %109 = tpu.matmul %97, %108, %cst_51 {dimension_numbers = #tpu.dot_dimension_numbers<[1], [0], [0], [1], [0, 0, 1, 1], [], []>} : vector<32x128xf32>, vector<128x128xf32>, vector<32x128xf32> -> vector<32x128xf32>
    %110 = arith.addf %106, %109 : vector<32x128xf32>
    %c2_52 = arith.constant 2 : index
    %c0_53 = arith.constant 0 : index
    %c0_54 = arith.constant 0 : index
    %111 = vector.load %arg2[%c2_52, %c0_53, %c0_54] : memref<3x128x128xf32, #tpu.memory_space<vmem>>, vector<1x128x128xf32>
    %112 = vector.shape_cast %111 : vector<1x128x128xf32> to vector<128x128xf32>
    %cst_55 = arith.constant dense<0.000000e+00> : vector<32x128xf32>
    %113 = tpu.matmul %103, %112, %cst_55 {dimension_numbers = #tpu.dot_dimension_numbers<[1], [0], [0], [1], [0, 0, 1, 1], [], []>} : vector<32x128xf32>, vector<128x128xf32>, vector<32x128xf32> -> vector<32x128xf32>
    %114 = arith.addf %110, %113 : vector<32x128xf32>
    %115 = vector.broadcast %73 : vector<1x128xf32> to vector<32x128xf32>
    %116 = arith.addf %114, %115 : vector<32x128xf32>
    %c0_56 = arith.constant 0 : index
    %c0_57 = arith.constant 0 : index
    %117 = vector.load %arg7[%c0_56, %c0_57] : memref<1x128xf32, #tpu.memory_space<vmem>>, vector<1x128xf32>
    %c0_58 = arith.constant 0 : index
    %c0_59 = arith.constant 0 : index
    %118 = vector.load %arg8[%c0_58, %c0_59] : memref<1x128xf32, #tpu.memory_space<vmem>>, vector<1x128xf32>
    %cst_60 = arith.constant 0.000000e+00 : f32
    %119 = vector.broadcast %cst_60 : f32 to vector<32x128xf32>
    %120 = arith.maximumf %116, %119 : vector<32x128xf32>
    %cst_61 = arith.constant dense<0.000000e+00> : vector<128xf32>
    %121 = vector.multi_reduction <add>, %120, %cst_61 [0] : vector<32x128xf32> to vector<128xf32>
    %122 = vector.shape_cast %121 : vector<128xf32> to vector<1x128xf32>
    %123 = arith.mulf %120, %120 : vector<32x128xf32>
    %cst_62 = arith.constant dense<0.000000e+00> : vector<128xf32>
    %124 = vector.multi_reduction <add>, %123, %cst_62 [0] : vector<32x128xf32> to vector<128xf32>
    %125 = vector.shape_cast %124 : vector<128xf32> to vector<1x128xf32>
    %126 = tpu.concatenate %122, %125 in 0 : vector<1x128xf32>, vector<1x128xf32> -> vector<2x128xf32>
    %cst_63 = arith.constant dense<0.000000e+00> : vector<2x128xf32>
    %127 = tpu.matmul %126, %0, %cst_63 {dimension_numbers = #tpu.dot_dimension_numbers<[1], [0], [0], [1], [0, 0, 1, 1], [], []>} : vector<2x128xf32>, vector<128x128xf32>, vector<2x128xf32> -> vector<2x128xf32>
    %cst_64 = arith.constant 0.001953125 : f32
    %128 = vector.broadcast %cst_64 : f32 to vector<2x128xf32>
    %129 = arith.mulf %127, %128 : vector<2x128xf32>
    %130 = vector.extract_strided_slice %129 {offsets = [0, 0], sizes = [1, 128], strides = [1, 1]} : vector<2x128xf32> to vector<1x128xf32>
    %131 = vector.extract_strided_slice %129 {offsets = [1, 0], sizes = [1, 128], strides = [1, 1]} : vector<2x128xf32> to vector<1x128xf32>
    %132 = arith.mulf %130, %130 : vector<1x128xf32>
    %133 = arith.subf %131, %132 : vector<1x128xf32>
    %cst_65 = arith.constant 9.99999974E-6 : f32
    %134 = vector.broadcast %cst_65 : f32 to vector<1x128xf32>
    %135 = arith.addf %133, %134 : vector<1x128xf32>
    %136 = math.rsqrt %135 : vector<1x128xf32>
    %137 = arith.mulf %117, %136 : vector<1x128xf32>
    %138 = arith.mulf %130, %137 : vector<1x128xf32>
    %139 = arith.subf %118, %138 : vector<1x128xf32>
    %140 = vector.broadcast %137 : vector<1x128xf32> to vector<32x128xf32>
    %141 = arith.mulf %120, %140 : vector<32x128xf32>
    %142 = vector.broadcast %139 : vector<1x128xf32> to vector<32x128xf32>
    %143 = arith.addf %141, %142 : vector<32x128xf32>
    %c0_66 = arith.constant 0 : index
    %c0_67 = arith.constant 0 : index
    %144 = vector.load %arg10[%c0_66, %c0_67] : memref<32x128xf32, #tpu.memory_space<vmem>>, vector<32x128xf32>
    tpu.vector_store %arg10[%c0_66, %c0_67], %143 {strides = array<i32>} : memref<32x128xf32, #tpu.memory_space<vmem>>, vector<32x128xf32>,
    return
  }
}

</mosaic_0001>

<bundles_post_ra>
// kernel: tpu_custom_call.1
= control target key start
LH: loop header
LB: loop body
LE: loop exit
PB: predicated region body
PF: predicated region fallthrough
CT: control target
= control target key end

     0   :  { %15 = vsyncpa [#allocation3], 0  ;;  %s1127_s0 = inlined_call_operand.hbm [shape: f32[32,64], index: 0, kind: input, shape index: {}]   ;;  %s1128_s1 = inlined_call_operand.hbm [shape: f32[3,64,128], index: 1, kind: input, shape index: {}]   ;;  %s1129_s2 = inlined_call_operand.hbm [shape: f32[3,128,128], index: 2, kind: input, shape index: {}]   ;;  %s1130_s3 = inlined_call_operand.vmem [shape: f32[1,128], index: 3, kind: input, shape index: {}]   ;;  %s1131_s4 = inlined_call_operand.vmem [shape: f32[1,128], index: 4, kind: input, shape index: {}]   ;;  %s1132_s5 = inlined_call_operand.vmem [shape: f32[1,128], index: 5, kind: input, shape index: {}]   ;;  %s1133_s6 = inlined_call_operand.vmem [shape: f32[1,128], index: 6, kind: input, shape index: {}]   ;;  %s1134_s7 = inlined_call_operand.vmem [shape: f32[1,128], index: 7, kind: input, shape index: {}]   ;;  %s1135_s8 = inlined_call_operand.vmem [shape: f32[1,128], index: 8, kind: input, shape index: {}]   ;;  %s1136_s9 = inlined_call_operand.hbm [shape: f32[128,128], index: 9, kind: input, shape index: {}]   ;;  %s1137_s10 = inlined_call_operand.hbm [shape: f32[32,128], index: 10, kind: output, shape index: {}]  }
   0x1   :  { %16 = vsyncpa [#allocation6], 0 }
   0x2   :  { %17 = vsyncpa [#allocation9], 0 }
   0x3   :  { %18 = vsyncpa [#allocation4], 0  ;;  %s36_s15 = sshll.u32 %s1128_s1, 4  ;;  %s919_s16 = smov [#allocation5]   ;;  %s37_s15 = int_to_ptr.hbm [resolvable:$true] %s36_s15 }
   0x4   :  { %s38_s17 = sshll.u32 %s919_s16, 4  ;;  %s23_s20 = sshll.u32 %s1127_s0, 4  ;;  %s39_s17 = int_to_ptr.vmem [resolvable:$true] %s38_s17  ;;  %s24_s20 = int_to_ptr.hbm [resolvable:$true] %s23_s20 }
   0x5   :  { %s920_s21 = smov 128   ;;  %s921_s22 = smov 8  }
   0x6   :  { %44 = dma.hbm_to_vmem [thread:$0]  %s37_s15, 3072, %s39_s17, [#allocation6], %s920_s21, %s920_s21, %s921_s22  }
   0x7   :  { %s922_s23 = smov [#allocation2]   ;;  %s49_s1 = sshll.u32 %s1129_s2, 4  ;;  %s50_s1 = int_to_ptr.hbm [resolvable:$true] %s49_s1 }
   0x8   :  { %s25_s24 = sshll.u32 %s922_s23, 4  ;;  %s74_s28 = sshll.u32 %s1136_s9, 4  ;;  %s26_s24 = int_to_ptr.vmem [resolvable:$true] %s25_s24  ;;  %s75_s28 = int_to_ptr.hbm [resolvable:$true] %s74_s28 }
   0x9   :  { %31 = dma.hbm_to_vmem [thread:$0]  %s24_s20, 512, %s26_s24, [#allocation3], %s920_s21, %s920_s21, %s921_s22  }
   0xa   :  { %s923_s29 = smov [#allocation7]   ;;  %s924_s11 = smov [#allocation8]  }
   0xb   :  { %s51_s30 = sshll.u32 %s923_s29, 4  ;;  %s76_s2 = sshll.u32 %s924_s11, 4  ;;  %s52_s30 = int_to_ptr.vmem [resolvable:$true] %s51_s30  ;;  %s77_s2 = int_to_ptr.vmem [resolvable:$true] %s76_s2 }
   0xc   :  { %57 = dma.hbm_to_vmem [thread:$0]  %s50_s1, 6144, %s52_s30, [#allocation6], %s920_s21, %s920_s21, %s921_s22  }
   0xd   :  { %82 = dma.hbm_to_vmem [thread:$0]  %s75_s28, 2048, %s77_s2, [#allocation9], %s920_s21, %s920_s21, %s921_s22  }
   0xe   :  { %911 = dma.done.wait [#allocation3], 512  }
   0xf   :  { %912 = vsyncadd [#allocation3], 4294966784 }
  0x10   :  { %913 = dma.done.wait [#allocation6], 9216  }
  0x11   :  { %914 = vsyncadd [#allocation6], 4294958080 }
  0x12   :  { %915 = dma.done.wait [#allocation9], 2048  }
  0x13   :  { %916 = vsyncadd [#allocation9], 4294965248  ;;  %v120_v0 = vlaneseq  ;;  %v323_v1 = vld [vmem:[#allocation5 + $0xb8] sm:$0xff]  ;;  %v322_v2 = vld [vmem:[#allocation5 + $0xb0] sm:$0xff]  ;;  %vm181_vm0 = vcmask 1040384   ;;  %vm202_vm1 = vcmask 1046528  }
  0x14   :  { %v235_v3 = vld [vmem:[#allocation5 + $0x38] sm:$0xff]  ;;  %344 = vmatpush.msra.mxu2 %v323_v1  ;;  %v234_v5 = vld [vmem:[#allocation5 + $0x30] sm:$0xff]  ;;  %v321_v6 = vld [vmem:[#allocation5 + $0xa8] sm:$0xff]  ;;  %vm236_vm3 = vcmask 523264   ;;  %s925_s19 = smov [#allocation10]   ;;  %s747_s24 = sshll.u32 %s1137_s10, 4  ;;  %s748_s24 = int_to_ptr.hbm [resolvable:$true] %s747_s24 }
  0x15   :  { %257 = vmatpush.msra.mxu0 %v235_v3  ;;  %v227_v4 = vld [vmem:[#allocation5 + $0x78] sm:$0xff]  ;;  %v226_v7 = vld [vmem:[#allocation5 + $0x70] sm:$0xff]  ;;  %v233_v8 = vld [vmem:[#allocation5 + $0x28] sm:$0xff]  ;;  %v1005_v10 = vshrl.u32 %v120_v0, 7  ;;  %s745_s20 = sshll.u32 %s925_s19, 4  ;;  %s746_s20 = int_to_ptr.vmem [resolvable:$true] %s745_s20 }
  0x16   :  { %294 = vmatpush.msra.mxu1 %v227_v4  ;;  %345 = vmatpush.msra.mxu2 %v322_v2  ;;  %v225_v9 = vld [vmem:[#allocation5 + $0x68] sm:$0xff]  ;;  %v320_v11 = vld [vmem:[#allocation5 + $0xa0] sm:$0xff]  ;;  %v319_v14 = vld [vmem:[#allocation5 + $0x98] sm:$0xff] }
  0x17   :  { %258 = vmatpush.msra.mxu0 %v234_v5  ;;  %v232_v12 = vld [vmem:[#allocation5 + $0x20] sm:$0xff]  ;;  %v231_v15 = vld [vmem:[#allocation5 + $0x18] sm:$0xff]  ;;  %v116_v18 = vld [vmem:[#allocation2 + $0x8] sm:$0xff]  ;;  %v129_v19 = vand.u32 15, %v1005_v10  ;;  %v122_v28 = vadd.s32 8, %v1005_v10  ;;  %v123_v43 = vadd.s32 16, %v1005_v10 }
  0x18   :  { %295 = vmatpush.msra.mxu1 %v226_v7  ;;  %346 = vmatpush.msra.mxu2 %v321_v6  ;;  %v224_v13 = vld [vmem:[#allocation5 + $0x60] sm:$0xff]  ;;  %v223_v17 = vld [vmem:[#allocation5 + $0x58] sm:$0xff]  ;;  %v318_v21 = vld [vmem:[#allocation5 + $0x90] sm:$0xff]  ;;  %v204_v25 = vrot.slane %v116_v18, 1  ;;  %v183_v42 = vrot.slane %v116_v18, 7  ;;  %v124_v50 = vadd.s32 24, %v1005_v10 }
  0x19   :  { %259 = vmatpush.msra.mxu0 %v233_v8  ;;  %v115_v16 = vld [vmem:[#allocation2] sm:$0xff]  ;;  %v230_v22 = vld [vmem:[#allocation5 + $0x10] sm:$0xff]  ;;  %v317_v26 = vld [vmem:[#allocation5 + $0x88] sm:$0xff]  ;;  %vm1009_vm2 = vcmp.gt.s32.totalorder %v129_v19, 0  ;;  %v136_v38 = vand.u32 15, %v122_v28  ;;  %v143_v47 = vand.u32 15, %v123_v43 }
  0x1a   :  { %296 = vmatpush.msra.mxu1 %v225_v9  ;;  %347 = vmatpush.msra.mxu2 %v320_v11  ;;  %v182_v20 = vrot.slane %v115_v16, 7  ;;  %v222_v23 = vld [vmem:[#allocation5 + $0x50] sm:$0xff]  ;;  %v203_v24 = vrot.slane %v115_v16, 1  ;;  %v229_v27 = vld [vmem:[#allocation5 + $0x8] sm:$0xff]  ;;  %v316_v33 = vld [vmem:[#allocation5 + $0x80] sm:$0xff]  ;;  %v150_v55 = vand.u32 15, %v124_v50 }
  0x1b   :  { %260 = vmatpush.msra.mxu0 %v232_v12  ;;  %v221_v29 = vld [vmem:[#allocation5 + $0x48] sm:$0xff]  ;;  %v117_v32 = vld [vmem:[#allocation2 + $0x10] sm:$0xff]  ;;  %v228_v34 = vld [vmem:[#allocation5] sm:$0xff]  ;;  %vm1020_vm4 = vcmp.lt.s32.totalorder %v136_v38, 15  ;;  %vm1033_vm5 = vcmp.gt.s32.totalorder %v143_v47, 0 }
  0x1c   :  { %297 = vmatpush.msra.mxu1 %v224_v13  ;;  %348 = vmatpush.msra.mxu2 %v319_v14  ;;  %v193_v31 = vsel %vm181_vm0, 0.0, %v182_v20  ;;  %v205_v35 = vsel %vm202_vm1, %v203_v24, %v204_v25  ;;  %v220_v36 = vld [vmem:[#allocation5 + $0x40] sm:$0xff]  ;;  %v206_v39 = vrot.slane %v117_v32, 1  ;;  %v184_v45 = vsel %vm181_vm0, %v182_v20, %v183_v42  ;;  %v118_v46 = vld [vmem:[#allocation2 + $0x18] sm:$0xff]  ;;  %v113_v62 = vld [vmem:[#allocation8 + $0x70] sm:$0xff] }
  0x1d   :  { %261 = vmatpush.msra.mxu0 %v231_v15  ;;  %v194_v37 = vsel %vm1009_vm2, %v193_v31, 0.0  ;;  %v185_v48 = vrot.slane %v117_v32, 7  ;;  %v208_v49 = vrot.slane %v118_v46, 1  ;;  %vm1044_vm6 = vcmp.lt.s32.totalorder %v150_v55, 15  ;;  %v114_v61 = vld [vmem:[#allocation8 + $0x78] sm:$0xff]  ;;  %v112_v63 = vld [vmem:[#allocation8 + $0x68] sm:$0xff] }
  0x1e   :  { %298 = vmatpush.msra.mxu1 %v223_v17  ;;  %349 = vmatpush.msra.mxu2 %v318_v21  ;;  %v207_v41 = vsel %vm202_vm1, %v204_v25, %v206_v39  ;;  %v187_v58 = vrot.slane %v118_v46, 7  ;;  %v111_v0 = vld [vmem:[#allocation8 + $0x60] sm:$0xff]  ;;  %v110_v1 = vld [vmem:[#allocation8 + $0x58] sm:$0xff]  ;;  %v109_v2 = vld [vmem:[#allocation8 + $0x50] sm:$0xff] }
  0x1f   :  { %262 = vmatpush.msra.mxu0 %v230_v22  ;;  %v216_v44 = vsel %vm1020_vm4, %v207_v41, 0.0  ;;  %v186_v52 = vsel %vm181_vm0, %v183_v42, %v185_v48  ;;  %v209_v53 = vsel %vm202_vm1, %v206_v39, %v208_v49  ;;  %v214_v57 = vsel %vm202_vm1, %v208_v49, 0.0  ;;  %405 = vmatpush.msra.mxu3 %v114_v61  ;;  %v108_v5 = vld [vmem:[#allocation8 + $0x48] sm:$0xff]  ;;  %v107_v6 = vld [vmem:[#allocation8 + $0x40] sm:$0xff]  ;;  %v106_v8 = vld [vmem:[#allocation8 + $0x38] sm:$0xff] }
  0x20   :  { %299 = vmatpush.msra.mxu1 %v222_v23  ;;  %350 = vmatpush.msra.mxu2 %v317_v26  ;;  %v196_v54 = vsel %vm1033_vm5, %v186_v52, 0.0  ;;  %v218_v59 = vsel %vm1044_vm6, %v214_v57, 0.0  ;;  %v188_v60 = vsel %vm181_vm0, %v185_v48, %v187_v58  ;;  %v105_v9 = vld [vmem:[#allocation8 + $0x30] sm:$0xff]  ;;  %v104_v10 = vld [vmem:[#allocation8 + $0x28] sm:$0xff]  ;;  %v103_v13 = vld [vmem:[#allocation8 + $0x20] sm:$0xff] }
  0x21   :  { %263 = vmatpush.msra.mxu0 %v229_v27  ;;  %406 = vmatpush.msra.mxu3 %v113_v62  ;;  %v102_v14 = vld [vmem:[#allocation8 + $0x18] sm:$0xff]  ;;  %v99_v22 = vld [vmem:[#allocation8] sm:$0xff] }
  0x22   :  { %300 = vmatpush.msra.mxu1 %v221_v29  ;;  %351 = vmatpush.msra.mxu2 %v316_v33  ;;  %v785_v26 = vld [vmem:[%s1130_s3] ss:$0 sm:$0xff] }
  0x23   :  { %264 = vmatpush.msra.mxu0 %v228_v34  ;;  %770 = vmatmul.msk.f32.vlgmr.msra.gmra.mxu2 %vm236_vm3, %v205_v35 }
  0x24   :  { %301 = vmatpush.msra.mxu1 %v220_v36  ;;  %762 = vmatmul.msk.f32.vlgmr.msra.gmra.mxu0 %vm236_vm3, %v194_v37 }
  0x25   :  { %766 = vmatmul.msk.f32.vlgmr.msra.gmra.mxu1 %vm236_vm3, %v115_v16  ;;  %407 = vmatpush.msra.mxu3 %v112_v63  ;;  %v101_v16 = vld [vmem:[#allocation8 + $0x10] sm:$0xff] }
  0x27   :  { %408 = vmatpush.msra.mxu3 %v111_v0 }
  0x29   :  { %409 = vmatpush.msra.mxu3 %v110_v1 }
  0x2b   :  { %771 = vmatmul.msk.f32.gmra.mxu2 %vm236_vm3, %v216_v44  ;;  %410 = vmatpush.msra.mxu3 %v109_v2 }
  0x2c   :  { %763 = vmatmul.msk.f32.gmra.mxu0 %vm236_vm3, %v184_v45 }
  0x2d   :  { %767 = vmatmul.msk.f32.gmra.mxu1 %vm236_vm3, %v116_v18  ;;  %411 = vmatpush.msra.mxu3 %v108_v5  ;;  %v100_v18 = vld [vmem:[#allocation8 + $0x8] sm:$0xff] }
  0x2f   :  { %412 = vmatpush.msra.mxu3 %v107_v6 }
  0x31   :  { %413 = vmatpush.msra.mxu3 %v106_v8 }
  0x33   :  { %772 = vmatmul.msk.f32.gmra.mxu2 %vm236_vm3, %v209_v53  ;;  %414 = vmatpush.msra.mxu3 %v105_v9 }
  0x34   :  { %764 = vmatmul.msk.f32.gmra.mxu0 %vm236_vm3, %v196_v54 }
  0x35   :  { %768 = vmatmul.msk.f32.gmra.mxu1 %vm236_vm3, %v117_v32  ;;  %415 = vmatpush.msra.mxu3 %v104_v10 }
  0x37   :  { %416 = vmatpush.msra.mxu3 %v103_v13 }
  0x39   :  { %417 = vmatpush.msra.mxu3 %v102_v14 }
  0x3b   :  { %773 = vmatmul.msk.f32.gmra.mxu2 %vm236_vm3, %v218_v59  ;;  %418 = vmatpush.msra.mxu3 %v101_v16 }
  0x3c   :  { %765 = vmatmul.msk.f32.gmra.mxu0 %vm236_vm3, %v188_v60 }
  0x3d   :  { %769 = vmatmul.msk.f32.gmra.mxu1 %vm236_vm3, %v118_v46  ;;  %419 = vmatpush.msra.mxu3 %v100_v18 }
  0x3f   :  { %420 = vmatpush.msra.mxu3 %v99_v22 }
  0x41   :  { %678 = vmatpush.msrb.mxu3 %v114_v61 }
  0x43   :  { %679 = vmatpush.msrb.mxu3 %v113_v62 }
  0x45   :  { %680 = vmatpush.msrb.mxu3 %v112_v63 }
  0x47   :  { %681 = vmatpush.msrb.mxu3 %v111_v0 }
  0x49   :  { %682 = vmatpush.msrb.mxu3 %v110_v1 }
  0x4b   :  { %683 = vmatpush.msrb.mxu3 %v109_v2 }
  0x4d   :  { %684 = vmatpush.msrb.mxu3 %v108_v5  ;;  %v517_v5 = vld [vmem:[#allocation7 + $0xf8] sm:$0xff] }
  0x4e   :  { %563 = vmatpush.msrb.mxu1 %v517_v5 }
  0x4f   :  { %685 = vmatpush.msrb.mxu3 %v107_v6  ;;  %v516_v6 = vld [vmem:[#allocation7 + $0xf0] sm:$0xff] }
  0x50   :  { %564 = vmatpush.msrb.mxu1 %v516_v6 }
  0x51   :  { %686 = vmatpush.msrb.mxu3 %v106_v8  ;;  %v533_v8 = vld [vmem:[#allocation7 + $0x78] sm:$0xff] }
  0x52   :  { %534 = vmatpush.msrb.mxu0 %v533_v8 }
  0x53   :  { %687 = vmatpush.msrb.mxu3 %v105_v9  ;;  %v515_v9 = vld [vmem:[#allocation7 + $0xe8] sm:$0xff] }
  0x54   :  { %565 = vmatpush.msrb.mxu1 %v515_v9 }
  0x55   :  { %688 = vmatpush.msrb.mxu3 %v104_v10  ;;  %v607_v10 = vld [vmem:[#allocation7 + $0x170] sm:$0xff] }
  0x57   :  { %689 = vmatpush.msrb.mxu3 %v103_v13  ;;  %v606_v13 = vld [vmem:[#allocation7 + $0x168] sm:$0xff] }
  0x59   :  { %690 = vmatpush.msrb.mxu3 %v102_v14  ;;  %v531_v14 = vld [vmem:[#allocation7 + $0x68] sm:$0xff] }
  0x5b   :  { %691 = vmatpush.msrb.mxu3 %v101_v16  ;;  %v605_v16 = vld [vmem:[#allocation7 + $0x160] sm:$0xff] }
  0x5d   :  { %692 = vmatpush.msrb.mxu3 %v100_v18  ;;  %v512_v18 = vld [vmem:[#allocation7 + $0xd0] sm:$0xff] }
  0x5f   :  { %693 = vmatpush.msrb.mxu3 %v99_v22  ;;  %v603_v22 = vld [vmem:[#allocation7 + $0x150] sm:$0xff] }
  0xa1   :  { %v266_v3 = vpop.f32.mrf.mxu0 }
  0xa2   :  { %v303_v4 = vpop.f32.mrf.mxu1 }
  0xa3   :  { %v304_v19 = vadd.f32 %v303_v4, %v266_v3 }
  0xa6   :  { %v353_v7 = vpop.f32.mrf.mxu2 }
  0xa7   :  { %v365_v25 = vadd.f32 %v353_v7, %v304_v19  ;;  %v608_v7 = vld [vmem:[#allocation7 + $0x178] sm:$0xff] }
  0xa8   :  { %609 = vmatpush.msrb.mxu2 %v608_v7  ;;  %v604_v19 = vld [vmem:[#allocation7 + $0x158] sm:$0xff] }
  0xa9   :  { %v269_v11 = vpop.f32.mrf.mxu0  ;;  %v372_v31 = vadd.f32 %v785_v26, %v365_v25  ;;  %v602_v25 = vld [vmem:[#allocation7 + $0x148] sm:$0xff] }
  0xaa   :  { %v306_v12 = vpop.f32.mrf.mxu1  ;;  %610 = vmatpush.msrb.mxu2 %v607_v10  ;;  %v376_v10 = vld [vmem:[%s1131_s4] sm:$0x1] }
  0xab   :  { %v307_v17 = vadd.f32 %v306_v12, %v269_v11  ;;  %v1060_v37 = vmax.f32 %v372_v31, 0.0  ;;  %v532_v11 = vld [vmem:[#allocation7 + $0x70] sm:$0xff]  ;;  %v514_v12 = vld [vmem:[#allocation7 + $0xe0] sm:$0xff] }
  0xac   :  { %535 = vmatpush.msrb.mxu0 %v532_v11  ;;  %566 = vmatpush.msrb.mxu1 %v514_v12  ;;  %v526_v31 = vld [vmem:[#allocation7 + $0x40] sm:$0xff] }
  0xad   :  { %v391_v43 = vmul.f32 %v1060_v37, %v1060_v37  ;;  %611 = vmatpush.msrb.mxu2 %v606_v13  ;;  %v377_v13 = vld [vmem:[%s1132_s5] sm:$0x1] }
  0xae   :  { %v356_v15 = vpop.f32.mrf.mxu2  ;;  %536 = vmatpush.msrb.mxu0 %v531_v14 }
  0xaf   :  { %v366_v23 = vadd.f32 %v356_v15, %v307_v17  ;;  %v513_v15 = vld [vmem:[#allocation7 + $0xd8] sm:$0xff]  ;;  %v530_v17 = vld [vmem:[#allocation7 + $0x60] sm:$0xff]  ;;  %612 = vmatpush.msrb.mxu2 %v605_v16 }
  0xb0   :  { %567 = vmatpush.msrb.mxu1 %v513_v15  ;;  %537 = vmatpush.msrb.mxu0 %v530_v17 }
  0xb1   :  { %v272_v20 = vpop.f32.mrf.mxu0  ;;  %v373_v28 = vadd.f32 %v785_v26, %v366_v23  ;;  %613 = vmatpush.msrb.mxu2 %v604_v19  ;;  %v528_v23 = vld [vmem:[#allocation7 + $0x50] sm:$0xff] }
  0xb2   :  { %v309_v21 = vpop.f32.mrf.mxu1  ;;  %568 = vmatpush.msrb.mxu1 %v512_v18 }
  0xb3   :  { %v310_v24 = vadd.f32 %v309_v21, %v272_v20  ;;  %v1058_v35 = vmax.f32 %v373_v28, 0.0  ;;  %v529_v20 = vld [vmem:[#allocation7 + $0x58] sm:$0xff]  ;;  %v511_v21 = vld [vmem:[#allocation7 + $0xc8] sm:$0xff]  ;;  %614 = vmatpush.msrb.mxu2 %v603_v22 }
  0xb4   :  { %538 = vmatpush.msrb.mxu0 %v529_v20  ;;  %569 = vmatpush.msrb.mxu1 %v511_v21 }
  0xb5   :  { %v392_v41 = vmul.f32 %v1058_v35, %v1058_v35  ;;  %v382_v44 = vadd.f32 %v1058_v35, %v1060_v37  ;;  %615 = vmatpush.msrb.mxu2 %v602_v25 }
  0xb6   :  { %v359_v27 = vpop.f32.mrf.mxu2  ;;  %539 = vmatpush.msrb.mxu0 %v528_v23 }
  0xb7   :  { %v367_v29 = vadd.f32 %v359_v27, %v310_v24  ;;  %v395_v47 = vadd.f32 %v392_v41, %v391_v43  ;;  %v510_v24 = vld [vmem:[#allocation7 + $0xc0] sm:$0xff]  ;;  %v509_v27 = vld [vmem:[#allocation7 + $0xb8] sm:$0xff]  ;;  %v507_v41 = vld [vmem:[#allocation7 + $0xa8] sm:$0xff] }
  0xb8   :  { %570 = vmatpush.msrb.mxu1 %v510_v24  ;;  %v524_v43 = vld [vmem:[#allocation7 + $0x30] sm:$0xff] }
  0xb9   :  { %v374_v32 = vadd.f32 %v785_v26, %v367_v29  ;;  %v275_v33 = vpop.f32.mrf.mxu0  ;;  %v601_v29 = vld [vmem:[#allocation7 + $0x140] sm:$0xff] }
  0xba   :  { %v312_v34 = vpop.f32.mrf.mxu1  ;;  %571 = vmatpush.msrb.mxu1 %v509_v27  ;;  %616 = vmatpush.msrb.mxu2 %v601_v29 }
  0xbb   :  { %v313_v36 = vadd.f32 %v312_v34, %v275_v33  ;;  %v1062_v38 = vmax.f32 %v374_v32, 0.0  ;;  %v508_v33 = vld [vmem:[#allocation7 + $0xb0] sm:$0xff]  ;;  %v600_v34 = vld [vmem:[#allocation7 + $0x138] sm:$0xff] }
  0xbc   :  { %572 = vmatpush.msrb.mxu1 %v508_v33  ;;  %617 = vmatpush.msrb.mxu2 %v600_v34 }
  0xbd   :  { %v393_v45 = vmul.f32 %v1062_v38, %v1062_v38  ;;  %v383_v48 = vadd.f32 %v382_v44, %v1062_v38 }
  0xbe   :  { %v362_v39 = vpop.f32.mrf.mxu2  ;;  %573 = vmatpush.msrb.mxu1 %v507_v41 }
  0xbf   :  { %v368_v42 = vadd.f32 %v362_v39, %v313_v36  ;;  %v396_v50 = vadd.f32 %v395_v47, %v393_v45  ;;  %v525_v36 = vld [vmem:[#allocation7 + $0x38] sm:$0xff]  ;;  %v506_v45 = vld [vmem:[#allocation7 + $0xa0] sm:$0xff]  ;;  %v523_v47 = vld [vmem:[#allocation7 + $0x28] sm:$0xff] }
  0xc0   :  { %574 = vmatpush.msrb.mxu1 %v506_v45 }
  0xc1   :  { %v375_v46 = vadd.f32 %v785_v26, %v368_v42  ;;  %v527_v26 = vld [vmem:[#allocation7 + $0x48] sm:$0xff]  ;;  %v599_v42 = vld [vmem:[#allocation7 + $0x130] sm:$0xff] }
  0xc2   :  { %540 = vmatpush.msrb.mxu0 %v527_v26  ;;  %618 = vmatpush.msrb.mxu2 %v599_v42 }
  0xc3   :  { %v1073_v49 = vmax.f32 %v375_v46, 0.0  ;;  %v598_v46 = vld [vmem:[#allocation7 + $0x128] sm:$0xff] }
  0xc4   :  { %541 = vmatpush.msrb.mxu0 %v526_v31  ;;  %619 = vmatpush.msrb.mxu2 %v598_v46 }
  0xc5   :  { %v384_v52 = vadd.f32 %v383_v48, %v1073_v49  ;;  %v394_v53 = vmul.f32 %v1073_v49, %v1073_v49 }
  0xc6   :  { %542 = vmatpush.msrb.mxu0 %v525_v36 }
  0xc7   :  { %v385_v54 = vrot.slane %v384_v52, 4  ;;  %v397_v55 = vadd.f32 %v396_v50, %v394_v53  ;;  %v505_v50 = vld [vmem:[#allocation7 + $0x98] sm:$0xff]  ;;  %v522_v53 = vld [vmem:[#allocation7 + $0x20] sm:$0xff] }
  0xc8   :  { %543 = vmatpush.msrb.mxu0 %v524_v43  ;;  %575 = vmatpush.msrb.mxu1 %v505_v50 }
  0xc9   :  { %v386_v57 = vadd.f32 %v385_v54, %v384_v52  ;;  %v398_v58 = vrot.slane %v397_v55, 4  ;;  %v597_v52 = vld [vmem:[#allocation7 + $0x120] sm:$0xff] }
  0xca   :  { %544 = vmatpush.msrb.mxu0 %v523_v47  ;;  %620 = vmatpush.msrb.mxu2 %v597_v52 }
  0xcb   :  { %v387_v59 = vrot.slane %v386_v57, 2  ;;  %v399_v60 = vadd.f32 %v398_v58, %v397_v55  ;;  %v504_v55 = vld [vmem:[#allocation7 + $0x90] sm:$0xff]  ;;  %v521_v58 = vld [vmem:[#allocation7 + $0x18] sm:$0xff] }
  0xcc   :  { %545 = vmatpush.msrb.mxu0 %v522_v53  ;;  %576 = vmatpush.msrb.mxu1 %v504_v55 }
  0xcd   :  { %v388_v61 = vadd.f32 %v387_v59, %v386_v57  ;;  %v400_v62 = vrot.slane %v399_v60, 2  ;;  %v596_v57 = vld [vmem:[#allocation7 + $0x118] sm:$0xff]  ;;  %v503_v59 = vld [vmem:[#allocation7 + $0x88] sm:$0xff] }
  0xce   :  { %621 = vmatpush.msrb.mxu2 %v596_v57  ;;  %546 = vmatpush.msrb.mxu0 %v521_v58 }
  0xcf   :  { %v389_v63 = vrot.slane %v388_v61, 1  ;;  %v401_v0 = vadd.f32 %v400_v62, %v399_v60  ;;  %v595_v60 = vld [vmem:[#allocation7 + $0x110] sm:$0xff]  ;;  %577 = vmatpush.msrb.mxu1 %v503_v59  ;;  %v502_v62 = vld [vmem:[#allocation7 + $0x80] sm:$0xff] }
  0xd0   :  { %622 = vmatpush.msrb.mxu2 %v595_v60 }
  0xd1   :  { %v402_v1 = vrot.slane %v401_v0, 1  ;;  %v390_v2 = vadd.f32 %v389_v63, %v388_v61  ;;  %v520_v61 = vld [vmem:[#allocation7 + $0x10] sm:$0xff]  ;;  %v594_v63 = vld [vmem:[#allocation7 + $0x108] sm:$0xff]  ;;  %578 = vmatpush.msrb.mxu1 %v502_v62 }
  0xd2   :  { %547 = vmatpush.msrb.mxu0 %v520_v61  ;;  %623 = vmatpush.msrb.mxu2 %v594_v63 }
  0xd3   :  { %v403_v3 = vadd.f32 %v402_v1, %v401_v0  ;;  %v519_v0 = vld [vmem:[#allocation7 + $0x8] sm:$0xff]  ;;  %v593_v1 = vld [vmem:[#allocation7 + $0x100] sm:$0xff] }
  0xd4   :  { %548 = vmatpush.msrb.mxu0 %v519_v0  ;;  %624 = vmatpush.msrb.mxu2 %v593_v1 }
  0xd5   :  { %v404_v4 = vsel %vm181_vm0, %v390_v2, %v403_v3  ;;  %v518_v2 = vld [vmem:[#allocation7] sm:$0xff] }
  0xd6   :  { %421 = vmatmul.f32.vlgmr.msra.gmra.mxu3 %v404_v4  ;;  %549 = vmatpush.msrb.mxu0 %v518_v2 }
 0x159   :  { %v422_v28 = vpop.f32.mrf.mxu3 }
 0x15a   :  { %v1079_v32 = vmul.f32 0.001953125, %v422_v28 }
 0x15c   :  { %v426_v39 = vmul.f32 %v1079_v32, %v1079_v32 }
 0x15e   :  { %v428_v44 = vrot.slane %v426_v39, 7 }
 0x160   :  { %v430_v48 = vsub.f32 %v1079_v32, %v428_v44 }
 0x162   :  { %v431_v54 = vadd.f32 1e-05, %v430_v48 }
 0x164   :  { %787 = vrsqrt.f32 %v431_v54  ;;  %vm438_vm8 = vweird.f32 %v431_v54 }
 0x16a   :  { %v788_v3 = vpop.eup %787 }
 0x16b   :  { %v433_v4 = vmul.f32 %v788_v3, %v431_v54  ;;  %vm439_vm7 = vweird.f32 %v788_v3  ;;  %v786_v54 = vld [vmem:[%s1133_s6] ss:$0 sm:$0xff] }
 0x16c   :  { %vm440_vm9 = vmor %vm438_vm8, %vm439_vm7 }
 0x16d   :  { %v434_v5 = vmul.f32 %v788_v3, %v433_v4 }
 0x16f   :  { %v435_v6 = vmul.f32 0.5, %v434_v5 }
 0x171   :  { %v436_v7 = vsub.f32 1.5, %v435_v6 }
 0x173   :  { %v437_v8 = vmul.f32 %v788_v3, %v436_v7 }
 0x175   :  { %v441_v9 = vsel %vm440_vm9, %v788_v3, %v437_v8 }
 0x176   :  { %443 = vst [vmem:[#allocation1] sm:$0xff] %v441_v9 }
 0x17d   :  { %v445_v11 = vld [vmem:[#allocation1 + $0x1] ss:$9 sm:$0xff] }
 0x17e   :  { %v447_v12 = vmul.f32 %v445_v11, %v376_v10 }
 0x180   :  { %v448_v14 = vmul.f32 %v447_v12, %v1079_v32  ;;  %v451_v15 = vperm.slane %v447_v12, 0 }
 0x182   :  { %v449_v16 = vsub.f32 %v377_v13, %v448_v14  ;;  %v453_v18 = vmul.f32 %v451_v15, %v1060_v37  ;;  %v454_v19 = vmul.f32 %v451_v15, %v1058_v35  ;;  %v455_v25 = vmul.f32 %v451_v15, %v1062_v38 }
 0x183   :  { %v456_v35 = vmul.f32 %v451_v15, %v1073_v49 }
 0x184   :  { %v458_v17 = vperm.slane %v449_v16, 0 }
 0x186   :  { %v460_v20 = vadd.f32 %v458_v17, %v453_v18  ;;  %v461_v21 = vadd.f32 %v458_v17, %v454_v19  ;;  %v462_v28 = vadd.f32 %v458_v17, %v455_v25  ;;  %v463_v33 = vadd.f32 %v458_v17, %v456_v35 }
 0x188   :  { %579 = vmatmul.f32.vlgmr.msrb.gmra.mxu1 %v460_v20  ;;  %v469_v22 = vrot.slane %v460_v20, 7  ;;  %v485_v23 = vrot.slane %v460_v20, 1  ;;  %v486_v24 = vrot.slane %v461_v21, 1  ;;  %v470_v37 = vrot.slane %v461_v21, 7 }
 0x189   :  { %v488_v29 = vrot.slane %v462_v28, 1  ;;  %v472_v38 = vrot.slane %v462_v28, 7  ;;  %v490_v34 = vrot.slane %v463_v33, 1  ;;  %v474_v49 = vrot.slane %v463_v33, 7 }
 0x18a   :  { %v480_v26 = vsel %vm181_vm0, 0.0, %v469_v22  ;;  %v487_v27 = vsel %vm202_vm1, %v485_v23, %v486_v24  ;;  %v471_v31 = vsel %vm181_vm0, %v469_v22, %v470_v37 }
 0x18b   :  { %774 = vmatmul.msk.f32.vlgmr.msrb.gmra.mxu0 %vm1009_vm2, %v480_v26  ;;  %625 = vmatmul.f32.vlgmr.msrb.gmra.mxu2 %v487_v27  ;;  %v489_v32 = vsel %vm202_vm1, %v486_v24, %v488_v29  ;;  %v473_v30 = vsel %vm181_vm0, %v470_v37, %v472_v38  ;;  %v491_v36 = vsel %vm202_vm1, %v488_v29, %v490_v34  ;;  %v496_v41 = vsel %vm202_vm1, %v490_v34, 0.0 }
 0x18c   :  { %v475_v39 = vsel %vm181_vm0, %v472_v38, %v474_v49 }
 0x190   :  { %582 = vmatmul.f32.gmra.mxu1 %v461_v21 }
 0x193   :  { %553 = vmatmul.f32.gmra.mxu0 %v471_v31  ;;  %776 = vmatmul.msk.f32.gmra.mxu2 %vm1020_vm4, %v489_v32 }
 0x198   :  { %585 = vmatmul.f32.gmra.mxu1 %v462_v28 }
 0x19b   :  { %775 = vmatmul.msk.f32.gmra.mxu0 %vm1033_vm5, %v473_v30  ;;  %631 = vmatmul.f32.gmra.mxu2 %v491_v36 }
 0x1a0   :  { %588 = vmatmul.f32.gmra.mxu1 %v463_v33 }
 0x1a3   :  { %559 = vmatmul.f32.gmra.mxu0 %v475_v39  ;;  %777 = vmatmul.msk.f32.gmra.mxu2 %vm1044_vm6, %v496_v41 }
 0x205   :  { %v580_v40 = vpop.f32.mrf.mxu1 }
 0x208   :  { %v551_v42 = vpop.f32.mrf.mxu0 }
 0x209   :  { %v581_v50 = vadd.f32 %v580_v40, %v551_v42  ;;  %v649_v42 = vld [vmem:[%s1134_s7] sm:$0x1] }
 0x20d   :  { %v583_v44 = vpop.f32.mrf.mxu1 }
 0x20e   :  { %v626_v43 = vpop.f32.mrf.mxu2 }
 0x20f   :  { %v638_v53 = vadd.f32 %v626_v43, %v581_v50 }
 0x210   :  { %v554_v45 = vpop.f32.mrf.mxu0 }
 0x211   :  { %v584_v51 = vadd.f32 %v583_v44, %v554_v45  ;;  %v645_v59 = vadd.f32 %v786_v54, %v638_v53  ;;  %v650_v45 = vld [vmem:[%s1135_s8] sm:$0x1] }
 0x213   :  { %v651_v0 = vmax.f32 %v645_v59, 0.0 }
 0x215   :  { %v586_v48 = vpop.f32.mrf.mxu1  ;;  %v664_v6 = vmul.f32 %v651_v0, %v651_v0 }
 0x216   :  { %v629_v46 = vpop.f32.mrf.mxu2 }
 0x217   :  { %v639_v52 = vadd.f32 %v629_v46, %v584_v51 }
 0x218   :  { %v557_v47 = vpop.f32.mrf.mxu0 }
 0x219   :  { %v587_v55 = vadd.f32 %v586_v48, %v557_v47  ;;  %v646_v56 = vadd.f32 %v786_v54, %v639_v52 }
 0x21b   :  { %v652_v62 = vmax.f32 %v646_v56, 0.0 }
 0x21d   :  { %v589_v63 = vpop.f32.mrf.mxu1  ;;  %v665_v4 = vmul.f32 %v652_v62, %v652_v62  ;;  %v655_v7 = vadd.f32 %v652_v62, %v651_v0 }
 0x21e   :  { %v632_v57 = vpop.f32.mrf.mxu2 }
 0x21f   :  { %v640_v58 = vadd.f32 %v632_v57, %v587_v55  ;;  %v668_v10 = vadd.f32 %v665_v4, %v664_v6 }
 0x220   :  { %v560_v61 = vpop.f32.mrf.mxu0 }
 0x221   :  { %v647_v60 = vadd.f32 %v786_v54, %v640_v58  ;;  %v590_v2 = vadd.f32 %v589_v63, %v560_v61 }
 0x223   :  { %v653_v1 = vmax.f32 %v647_v60, 0.0 }
 0x225   :  { %v666_v8 = vmul.f32 %v653_v1, %v653_v1  ;;  %v656_v11 = vadd.f32 %v655_v7, %v653_v1 }
 0x226   :  { %v635_v3 = vpop.f32.mrf.mxu2 }
 0x227   :  { %v641_v5 = vadd.f32 %v635_v3, %v590_v2  ;;  %v669_v13 = vadd.f32 %v668_v10, %v666_v8 }
 0x229   :  { %v648_v9 = vadd.f32 %v786_v54, %v641_v5 }
 0x22b   :  { %v654_v12 = vmax.f32 %v648_v9, 0.0 }
 0x22d   :  { %v657_v14 = vadd.f32 %v656_v11, %v654_v12  ;;  %v667_v15 = vmul.f32 %v654_v12, %v654_v12 }
 0x22f   :  { %v658_v16 = vrot.slane %v657_v14, 4  ;;  %v670_v17 = vadd.f32 %v669_v13, %v667_v15 }
 0x231   :  { %v659_v18 = vadd.f32 %v658_v16, %v657_v14  ;;  %v671_v19 = vrot.slane %v670_v17, 4 }
 0x233   :  { %v660_v20 = vrot.slane %v659_v18, 2  ;;  %v672_v21 = vadd.f32 %v671_v19, %v670_v17 }
 0x235   :  { %v661_v22 = vadd.f32 %v660_v20, %v659_v18  ;;  %v673_v23 = vrot.slane %v672_v21, 2 }
 0x237   :  { %v662_v24 = vrot.slane %v661_v22, 1  ;;  %v674_v25 = vadd.f32 %v673_v23, %v672_v21 }
 0x239   :  { %v675_v26 = vrot.slane %v674_v25, 1  ;;  %v663_v27 = vadd.f32 %v662_v24, %v661_v22 }
 0x23b   :  { %v676_v28 = vadd.f32 %v675_v26, %v674_v25 }
 0x23d   :  { %v677_v37 = vsel %vm181_vm0, %v663_v27, %v676_v28 }
 0x23e   :  { %694 = vmatmul.f32.vlgmr.msrb.gmra.mxu3 %v677_v37 }
 0x2c1   :  { %v695_v29 = vpop.f32.mrf.mxu3 }
 0x2c2   :  { %v698_v35 = vmul.f32 0.001953125, %v695_v29 }
 0x2c4   :  { %v699_v31 = vmul.f32 %v698_v35, %v698_v35 }
 0x2c6   :  { %v701_v32 = vrot.slane %v699_v31, 7 }
 0x2c8   :  { %v703_v33 = vsub.f32 %v698_v35, %v701_v32 }
 0x2ca   :  { %v704_v38 = vadd.f32 1e-05, %v703_v33 }
 0x2cc   :  { %789 = vrsqrt.f32 %v704_v38  ;;  %vm711_vm11 = vweird.f32 %v704_v38 }
 0x2d2   :  { %v790_v34 = vpop.eup %789 }
 0x2d3   :  { %v706_v30 = vmul.f32 %v790_v34, %v704_v38  ;;  %vm712_vm10 = vweird.f32 %v790_v34 }
 0x2d4   :  { %vm713_vm12 = vmor %vm711_vm11, %vm712_vm10 }
 0x2d5   :  { %v707_v36 = vmul.f32 %v790_v34, %v706_v30 }
 0x2d7   :  { %v708_v49 = vmul.f32 0.5, %v707_v36 }
 0x2d9   :  { %v709_v39 = vsub.f32 1.5, %v708_v49 }
 0x2db   :  { %v710_v41 = vmul.f32 %v790_v34, %v709_v39 }
 0x2dd   :  { %v714_v40 = vsel %vm713_vm12, %v790_v34, %v710_v41 }
 0x2de   :  { %716 = vst [vmem:[#allocation1] sm:$0xff] %v714_v40 }
 0x2e5   :  { %v718_v43 = vld [vmem:[#allocation1 + $0x1] ss:$9 sm:$0xff] }
 0x2e6   :  { %v720_v44 = vmul.f32 %v718_v43, %v649_v42 }
 0x2e8   :  { %v721_v46 = vmul.f32 %v720_v44, %v698_v35  ;;  %v724_v47 = vperm.slane %v720_v44, 0 }
 0x2ea   :  { %v722_v51 = vsub.f32 %v650_v45, %v721_v46  ;;  %v726_v50 = vmul.f32 %v724_v47, %v651_v0  ;;  %v727_v52 = vmul.f32 %v724_v47, %v652_v62  ;;  %v728_v53 = vmul.f32 %v724_v47, %v653_v1 }
 0x2eb   :  { %v729_v54 = vmul.f32 %v724_v47, %v654_v12 }
 0x2ec   :  { %v731_v48 = vperm.slane %v722_v51, 0 }
 0x2ee   :  { %v733_v55 = vadd.f32 %v731_v48, %v726_v50  ;;  %v734_v57 = vadd.f32 %v731_v48, %v727_v52  ;;  %v735_v56 = vadd.f32 %v731_v48, %v728_v53  ;;  %v736_v58 = vadd.f32 %v731_v48, %v729_v54 }
 0x2f0   :  { %737 = vst [vmem:[#allocation10] sm:$0xff] %v733_v55 }
 0x2f1   :  { %738 = vst [vmem:[#allocation10 + $0x8] sm:$0xff] %v734_v57 }
 0x2f2   :  { %739 = vst [vmem:[#allocation10 + $0x10] sm:$0xff] %v735_v56 }
 0x2f3   :  { %740 = vst [vmem:[#allocation10 + $0x18] sm:$0xff] %v736_v58 }
 0x2f4   :  { %753 = dma.vmem_to_hbm [thread:$0]  %s746_s20, 512, %s748_s24, [#allocation4], %s920_s21, %s920_s21, %s921_s22  }
 0x2f5   :  { %917 = dma.done.wait [#allocation4], 512  }
 0x2f6   :  { %918 = vsyncadd [#allocation4], 4294966784 }
 0x2f7   :  { %758 = vsyncpa [#allocation3], 1 }
 0x2f8   :  { %759 = vsyncpa [#allocation6], 1 }
 0x2f9   :  { %760 = vsyncpa [#allocation9], 1 }
 0x2fa   :  { %761 = vsyncpa [#allocation4], 1 }

</bundles_post_ra>
